<compile_context>
chip_gen: v6e
topology: v6e:2x2x1
jax: 0.10.0
libtpu: 0.0.40
codegen_flags: <defaults>
</compile_context>

<pallas_src>
import jax
import jax.numpy as jnp
from jax.experimental import pallas as pl
from jax.experimental.pallas import tpu as pltpu


def _round_up(x, m):
    return (x + m - 1) // m * m


def _pick_tile(dim, unit, cap):
    """Tile size (multiple of `unit`, <= cap) and padded dim (multiple of tile)."""
    t = min(cap, _round_up(dim, unit))
    return t, _round_up(dim, t)


def _conv_bn_kernel(w_ref, x_ref, bias_ref, o_ref, acc_ref):
    # w_ref:    (tco, tk)     bf16, BN scale pre-folded
    # x_ref:    (1, tk, tp)   bf16 patches
    # bias_ref: (tco, 1)      f32
    # o_ref:    (1, tco, tp)  f32
    # acc_ref:  (tco, tp)     f32 scratch accumulator
    kk = pl.program_id(3)

    @pl.when(kk == 0)
    def _():
        acc_ref[...] = jnp.zeros_like(acc_ref)

    acc_ref[...] += jnp.dot(w_ref[...], x_ref[0],
                            preferred_element_type=jnp.float32)

    @pl.when(kk == pl.num_programs(3) - 1)
    def _():
        o_ref[0, :, :] = (acc_ref[...] + bias_ref[...]).astype(o_ref.dtype)


def _conv_bn_matmul(w, patches, bias, *, tco, tk, tp):
    """w: (Cout_pad, K_pad); patches: (N, K_pad, P_pad); bias: (Cout_pad, 1)."""
    cout_pad, k_pad = w.shape
    n, _, p_pad = patches.shape
    grid = (n, cout_pad // tco, p_pad // tp, k_pad // tk)
    return pl.pallas_call(
        _conv_bn_kernel,
        out_shape=jax.ShapeDtypeStruct((n, cout_pad, p_pad), jnp.float32),
        grid_spec=pltpu.PrefetchScalarGridSpec(
            num_scalar_prefetch=0,
            grid=grid,
            in_specs=[
                pl.BlockSpec((tco, tk), lambda b, i, j, kk: (i, kk)),
                pl.BlockSpec((1, tk, tp), lambda b, i, j, kk: (b, kk, j)),
                pl.BlockSpec((tco, 1), lambda b, i, j, kk: (i, 0)),
            ],
            out_specs=pl.BlockSpec((1, tco, tp), lambda b, i, j, kk: (b, i, j)),
            scratch_shapes=[pltpu.VMEM((tco, tp), jnp.float32)],
        ),
        compiler_params=pltpu.CompilerParams(
            dimension_semantics=("parallel", "parallel", "parallel",
                                 "arbitrary")),
    )(w, patches, bias)


def _get_same_padding(kernel_size):
    assert kernel_size % 2 == 1, "kernel size should be odd"
    return kernel_size // 2


def _im2col_nkp(x, kernel_size, stride, dilation, padding):
    """x: (N, Cin, H, W) -> (N, Cin*k*k, H_out*W_out); K order = (Cin, kh, kw)."""
    n, cin, h, w = x.shape
    k, s, d, p = kernel_size, stride, dilation, padding
    x_pad = jnp.pad(x, ((0, 0), (0, 0), (p, p), (p, p)))
    h_out = (h + 2 * p - d * (k - 1) - 1) // s + 1
    w_out = (w + 2 * p - d * (k - 1) - 1) // s + 1
    # TODO(synk): for k>1 this materializes a k^2-replicated patch tensor in
    # HBM; folding the (kh,kw) offsets into extra reduction grid axes of the
    # Pallas kernel would avoid that traffic.  k==1 (the module default)
    # never reaches this path.
    patches = []
    for kh in range(k):
        for kw in range(k):
            sl = x_pad[:, :,
                       kh * d: kh * d + s * (h_out - 1) + 1: s,
                       kw * d: kw * d + s * (w_out - 1) + 1: s]
            patches.append(sl)                            # (N, Cin, Ho, Wo)
    patches = jnp.stack(patches, axis=2)                  # (N, Cin, k*k, Ho, Wo)
    patches = patches.reshape(n, cin * k * k, h_out * w_out)
    return patches, h_out, w_out


class DynamicConvBn2DNonFusedPallas:
    """JAX/Pallas port of DynamicConvBn2DNonFused (eval-mode forward)."""

    def __init__(self, max_in_channels, max_out_channels,
                 kernel_size=1, stride=1, dilation=1,
                 eps=1e-5, momentum=0.1,
                 compute_dtype=jnp.bfloat16, key=None):
        self.max_in_channels = max_in_channels
        self.max_out_channels = max_out_channels
        self.kernel_size = kernel_size
        self.stride = stride
        self.dilation = dilation
        self.eps = eps
        self.momentum = momentum
        self.compute_dtype = compute_dtype
        self.active_out_channel = max_out_channels

        if key is None:
            key = jax.random.PRNGKey(0)
        kw, kg, kb, km, kv = jax.random.split(key, 5)
        # conv weight: (max_out, max_in, k, k), no bias
        self.conv_weight = jax.random.normal(
            kw, (max_out_channels, max_in_channels, kernel_size, kernel_size),
            dtype=jnp.float32) * 0.1
        # BatchNorm2d params / running stats
        self.bn_weight = 1.0 + 0.1 * jax.random.normal(
            kg, (max_out_channels,), dtype=jnp.float32)
        self.bn_bias = 0.1 * jax.random.normal(
            kb, (max_out_channels,), dtype=jnp.float32)
        self.running_mean = 0.1 * jax.random.normal(
            km, (max_out_channels,), dtype=jnp.float32)
        self.running_var = 1.0 + 0.1 * jax.random.uniform(
            kv, (max_out_channels,), dtype=jnp.float32)

    def __call__(self, x, out_channel=None):
        # x: NCHW float32 -> NCHW float32
        if out_channel is None:
            out_channel = self.active_out_channel
        n, in_channel, h, w = x.shape
        ksz = self.kernel_size
        pad = _get_same_padding(ksz)

        filters = self.conv_weight[:out_channel, :in_channel, :, :]
        gamma = self.bn_weight[:out_channel]
        beta = self.bn_bias[:out_channel]
        mean = self.running_mean[:out_channel]
        var = self.running_var[:out_channel]
        scale = gamma * jax.lax.rsqrt(var + self.eps)          # (Cout,)
        bias = beta - mean * scale                             # (Cout,)

        # Patch tensor in NCHW-native (N, K, P) layout.
        if ksz == 1:
            xs = x[:, :, ::self.stride, ::self.stride] if self.stride > 1 else x
            h_out, w_out = xs.shape[2], xs.shape[3]
            patches = xs.reshape(n, in_channel, h_out * w_out)
        else:
            patches, h_out, w_out = _im2col_nkp(x, ksz, self.stride,
                                                self.dilation, pad)

        cout = out_channel
        kdim = in_channel * ksz * ksz
        pdim = h_out * w_out

        # Fold the BN scale into the weight so the kernel epilogue is acc+bias.
        w_mat = filters.reshape(cout, kdim).astype(jnp.float32) * scale[:, None]

        # Tile selection + zero padding to TPU-friendly multiples.
        tco, cout_pad = _pick_tile(cout, 8, 256)
        tk, k_pad = _pick_tile(kdim, 128, 512)
        tp, p_pad = _pick_tile(pdim, 128, 512)

        w_p = jnp.pad(w_mat, ((0, cout_pad - cout), (0, k_pad - kdim)))
        x_p = jnp.pad(patches.astype(jnp.float32),
                      ((0, 0), (0, k_pad - kdim), (0, p_pad - pdim)))
        bias_p = jnp.pad(bias, (0, cout_pad - cout)).reshape(cout_pad, 1)

        y = _conv_bn_matmul(w_p.astype(self.compute_dtype),
                            x_p.astype(self.compute_dtype),
                            bias_p.astype(jnp.float32),
                            tco=tco, tk=tk, tp=tp)     # (N, Cout_pad, P_pad)
        y = y[:, :cout, :pdim]
        return y.reshape(n, cout, h_out, w_out)


# ----------------------------- references ----------------------------------


def _reference_f32(module, x, out_channel):
    """Pure-JAX f32 reference (lax conv + eval BN)."""
    _, cin, _, _ = x.shape
    filters = module.conv_weight[:out_channel, :cin, :, :]
    pad = _get_same_padding(module.kernel_size)
    y = jax.lax.conv_general_dilated(
        x, filters,
        window_strides=(module.stride, module.stride),
        padding=[(pad, pad), (pad, pad)],
        rhs_dilation=(module.dilation, module.dilation),
        dimension_numbers=("NCHW", "OIHW", "NCHW"))
    gamma = module.bn_weight[:out_channel]
    beta = module.bn_bias[:out_channel]
    mean = module.running_mean[:out_channel]
    var = module.running_var[:out_channel]
    scale = gamma * jax.lax.rsqrt(var + module.eps)
    bias = beta - mean * scale
    return y * scale.reshape(1, -1, 1, 1) + bias.reshape(1, -1, 1, 1)


def _reference_matched(module, x, out_channel):
    """Reference matching the kernel's numerics: BN scale folded into the
    weight, bf16 MXU operands, f32 accumulation, f32 bias add."""
    _, cin, _, _ = x.shape
    pad = _get_same_padding(module.kernel_size)
    filters = module.conv_weight[:out_channel, :cin, :, :]
    gamma = module.bn_weight[:out_channel]
    beta = module.bn_bias[:out_channel]
    mean = module.running_mean[:out_channel]
    var = module.running_var[:out_channel]
    scale = gamma * jax.lax.rsqrt(var + module.eps)
    bias = beta - mean * scale
    w_scaled = (filters * scale[:, None, None, None]).astype(module.compute_dtype)
    y = jax.lax.conv_general_dilated(
        x.astype(module.compute_dtype), w_scaled,
        window_strides=(module.stride, module.stride),
        padding=[(pad, pad), (pad, pad)],
        rhs_dilation=(module.dilation, module.dilation),
        dimension_numbers=("NCHW", "OIHW", "NCHW"),
        preferred_element_type=jnp.float32)
    return y + bias.reshape(1, -1, 1, 1)


if __name__ == "__main__":
    key = jax.random.PRNGKey(0)
    k1, k2, kx = jax.random.split(key, 3)

    x = jax.random.normal(kx, (2, 4, 16, 16), dtype=jnp.float32)

    # --- test 1: kernel_size=1 (module default), full out channels ----------
    m1 = DynamicConvBn2DNonFusedPallas(
        max_in_channels=4, max_out_channels=8,
        kernel_size=1, stride=1, dilation=1, key=k1)
    out1 = jax.block_until_ready(m1(x))
    ref1_matched = _reference_matched(m1, x, 8)
    ref1_f32 = _reference_f32(m1, x, 8)
    assert out1.shape == ref1_f32.shape, (out1.shape, ref1_f32.shape)
    assert jnp.allclose(out1, ref1_matched, atol=1e-3, rtol=1e-3), \
        float(jnp.max(jnp.abs(out1 - ref1_matched)))
    assert jnp.allclose(out1, ref1_f32, atol=5e-2, rtol=5e-2), \
        float(jnp.max(jnp.abs(out1 - ref1_f32)))

    # --- test 2: kernel_size=3, stride=2, sliced out_channel (dynamic path) --
    m2 = DynamicConvBn2DNonFusedPallas(
        max_in_channels=4, max_out_channels=8,
        kernel_size=3, stride=2, dilation=1, key=k2)
    out2 = jax.block_until_ready(m2(x, out_channel=6))
    ref2_matched = _reference_matched(m2, x, 6)
    ref2_f32 = _reference_f32(m2, x, 6)
    assert out2.shape == ref2_f32.shape, (out2.shape, ref2_f32.shape)
    assert jnp.allclose(out2, ref2_matched, atol=1e-3, rtol=1e-3), \
        float(jnp.max(jnp.abs(out2 - ref2_matched)))
    assert jnp.allclose(out2, ref2_f32, atol=5e-2, rtol=5e-2), \
        float(jnp.max(jnp.abs(out2 - ref2_f32)))

    print("KERNEL_OK")
</pallas_src>

<mosaic_0001>
module attributes {stable_mosaic.version = 11 : i64} {
  func.func @_conv_bn_kernel(%arg0: i32, %arg1: i32, %arg2: i32, %arg3: i32, %arg4: memref<8x128xbf16, #tpu.memory_space<vmem>>, %arg5: memref<1x128x256xbf16, #tpu.memory_space<vmem>>, %arg6: memref<8x1xf32, #tpu.memory_space<vmem>>, %arg7: memref<1x8x256xf32, #tpu.memory_space<vmem>>, %arg8: memref<8x256xf32, #tpu.memory_space<vmem>>) attributes {dimension_semantics = [#tpu.dimension_semantics<parallel>, #tpu.dimension_semantics<parallel>, #tpu.dimension_semantics<parallel>, #tpu.dimension_semantics<arbitrary>], iteration_bounds = array<i64: 2, 1, 1, 1>, scalar_prefetch = 0 : i64, scratch_operands = 1 : i64, tpu.core_type = #tpu.core_type<tc>, window_params = [{transform_indices = @transform_0, window_bounds = array<i64: 8, 128>}, {transform_indices = @transform_1, window_bounds = array<i64: 1, 128, 256>}, {transform_indices = @transform_2, window_bounds = array<i64: 8, 1>}, {transform_indices = @transform_3, window_bounds = array<i64: 1, 8, 256>}]} {
    %c0_i32 = arith.constant 0 : i32
    %0 = arith.cmpi eq, %arg3, %c0_i32 : i32
    %1 = arith.extui %0 : i1 to i32
    %c0_i32_0 = arith.constant 0 : i32
    %2 = arith.cmpi ne, %1, %c0_i32_0 : i32
    scf.if %2 {
      %cst_11 = arith.constant 0.000000e+00 : f32
      %13 = vector.broadcast %cst_11 : f32 to vector<8x256xf32>
      %c0_12 = arith.constant 0 : index
      %c0_13 = arith.constant 0 : index
      %14 = vector.load %arg8[%c0_12, %c0_13] : memref<8x256xf32, #tpu.memory_space<vmem>>, vector<8x256xf32>
      tpu.vector_store %arg8[%c0_12, %c0_13], %13 {strides = array<i32>} : memref<8x256xf32, #tpu.memory_space<vmem>>, vector<8x256xf32>,
    } else {
    }
    %c0 = arith.constant 0 : index
    %c0_1 = arith.constant 0 : index
    %3 = vector.load %arg8[%c0, %c0_1] : memref<8x256xf32, #tpu.memory_space<vmem>>, vector<8x256xf32>
    %c0_2 = arith.constant 0 : index
    %c0_3 = arith.constant 0 : index
    %4 = vector.load %arg4[%c0_2, %c0_3] : memref<8x128xbf16, #tpu.memory_space<vmem>>, vector<8x128xbf16>
    %c0_4 = arith.constant 0 : index
    %c0_5 = arith.constant 0 : index
    %c0_6 = arith.constant 0 : index
    %5 = vector.load %arg5[%c0_4, %c0_5, %c0_6] : memref<1x128x256xbf16, #tpu.memory_space<vmem>>, vector<1x128x256xbf16>
    %6 = vector.shape_cast %5 : vector<1x128x256xbf16> to vector<128x256xbf16>
    %cst = arith.constant dense<0.000000e+00> : vector<8x256xf32>
    %7 = tpu.matmul %4, %6, %cst {dimension_numbers = #tpu.dot_dimension_numbers<[1], [0], [0], [1], [0, 0, 1, 1], [], []>} : vector<8x128xbf16>, vector<128x256xbf16>, vector<8x256xf32> -> vector<8x256xf32>
    %8 = arith.addf %3, %7 : vector<8x256xf32>
    %c0_7 = arith.constant 0 : index
    %c0_8 = arith.constant 0 : index
    %9 = vector.load %arg8[%c0_7, %c0_8] : memref<8x256xf32, #tpu.memory_space<vmem>>, vector<8x256xf32>
    tpu.vector_store %arg8[%c0_7, %c0_8], %8 {strides = array<i32>} : memref<8x256xf32, #tpu.memory_space<vmem>>, vector<8x256xf32>,
    %c0_i32_9 = arith.constant 0 : i32
    %10 = arith.cmpi eq, %arg3, %c0_i32_9 : i32
    %11 = arith.extui %10 : i1 to i32
    %c0_i32_10 = arith.constant 0 : i32
    %12 = arith.cmpi ne, %11, %c0_i32_10 : i32
    scf.if %12 {
      %c0_11 = arith.constant 0 : index
      %c0_12 = arith.constant 0 : index
      %13 = vector.load %arg8[%c0_11, %c0_12] : memref<8x256xf32, #tpu.memory_space<vmem>>, vector<8x256xf32>
      %c0_13 = arith.constant 0 : index
      %c0_14 = arith.constant 0 : index
      %14 = vector.load %arg6[%c0_13, %c0_14] : memref<8x1xf32, #tpu.memory_space<vmem>>, vector<8x1xf32>
      %15 = vector.broadcast %14 : vector<8x1xf32> to vector<8x256xf32>
      %16 = arith.addf %13, %15 : vector<8x256xf32>
      %c0_15 = arith.constant 0 : index
      %c0_16 = arith.constant 0 : index
      %c0_17 = arith.constant 0 : index
      %17 = vector.load %arg7[%c0_15, %c0_16, %c0_17] : memref<1x8x256xf32, #tpu.memory_space<vmem>>, vector<1x8x256xf32>
      %18 = vector.shape_cast %17 : vector<1x8x256xf32> to vector<8x256xf32>
      %19 = vector.shape_cast %16 : vector<8x256xf32> to vector<1x8x256xf32>
      tpu.vector_store %arg7[%c0_15, %c0_16, %c0_17], %19 {strides = array<i32>} : memref<1x8x256xf32, #tpu.memory_space<vmem>>, vector<1x8x256xf32>,
    } else {
    }
    return
  }
  func.func @transform_0(%arg0: i32, %arg1: i32, %arg2: i32, %arg3: i32) -> (i32, i32) {
    %c0_i32 = arith.constant 0 : i32
    return %arg1, %arg3 : i32, i32
  }
  func.func @transform_1(%arg0: i32, %arg1: i32, %arg2: i32, %arg3: i32) -> (i32, i32, i32) {
    %c0_i32 = arith.constant 0 : i32
    return %arg0, %arg3, %arg2 : i32, i32, i32
  }
  func.func @transform_2(%arg0: i32, %arg1: i32, %arg2: i32, %arg3: i32) -> (i32, i32) {
    %c0_i32 = arith.constant 0 : i32
    %c0_i32_0 = arith.constant 0 : i32
    return %arg1, %c0_i32 : i32, i32
  }
  func.func @transform_3(%arg0: i32, %arg1: i32, %arg2: i32, %arg3: i32) -> (i32, i32, i32) {
    %c0_i32 = arith.constant 0 : i32
    return %arg0, %arg1, %arg2 : i32, i32, i32
  }
}

</mosaic_0001>

<bundles_post_ra>
// kernel: tpu_custom_call.1
= control target key start
LH: loop header
LB: loop body
LE: loop exit
PB: predicated region body
PF: predicated region fallthrough
CT: control target
= control target key end

     0   :  { %8 = vsyncpa [#allocation4], 0  ;;  %s1017_s0 = inlined_call_operand.vmem [shape: bf16[8,128], index: 0, kind: input, shape index: {}]   ;;  %s1018_s1 = inlined_call_operand.hbm [shape: bf16[2,128,256], index: 1, kind: input, shape index: {}]   ;;  %s1019_s2 = inlined_call_operand.vmem [shape: f32[8,1], index: 2, kind: input, shape index: {}]   ;;  %s1020_s3 = inlined_call_operand.hbm [shape: f32[2,8,256], index: 3, kind: output, shape index: {}]  }
   0x1   :  { %10 = vsyncpa [#allocation4 + $0x1], 0 }
   0x2   :  { %11 = vsyncpa [#allocation5], 0 }
   0x3   :  { %13 = vsyncpa [#allocation5 + $0x1], 0  ;;  %s848_s12 = smov 0   ;;  %s850_s13 = smov 0  }
   0x4   :  { %s852_s14 = smov 0   ;;  %s854_s15 = smov 0  }
   0x5   :  { %s856_s16 = smov 0   ;;  %s858_s17 = smov 0  }
   0x6 LB: > { %s588_s18 = sadd.s32 4294967295, %s821_s17   ;;  %s589_s19 = sadd.s32 4294967294, %s821_s17   ;;  %s821_s17 = sphi %s858_s17, %s19_s17   ;;  %s817_s16 = sphi %s856_s16, %s1031_s16   ;;  %s813_s15 = sphi %s854_s15, %s1030_s15   ;;  %s809_s14 = sphi %s852_s14, %s1029_s14   ;;  %s805_s13 = sphi %s850_s13, %s1028_s13   ;;  %s801_s12 = sphi %s848_s12, %s1027_s12  }
   0x7   : > { %s45_s20 = sadd.s32 1, %s817_s16  ;;  %s84_s21 = sadd.s32 1, %s809_s14 }
   0x8   : > { %p47_p0 = scmp.ge.s32.totalorder %s45_s20, 2  ;;  %p91_p1 = scmp.ne.s32.totalorder %s809_s14, %s805_s13 }
   0x9   : > { %p92_p2 = scmp.eq.s32.totalorder %s821_s17, 0  ;;  %p97_p3 = scmp.ne.s32.totalorder %s805_s13, %s801_s12 }
   0xa   : > { %s1033_s20 = smov (%p47_p0, %s45_s20), 0  ;;  %p98_p5 = scmp.eq.s32.totalorder %s588_s18, 0 }
   0xb   : > { %p889_p4 = por %p92_p2, %p91_p1  ;;  %s77_s23 = ssub.s32 %s817_s16, %s1033_s20 }
   0xc   : > { %p151_p6 = scmp.eq.s32.totalorder %s588_s18, 1  ;;  %p82_p7 = scmp.eq.s32.totalorder %s77_s23, 0 }
   0xd   : > { %p895_p8 = por %p98_p5, %p97_p3  ;;  %p157_p10 = scmp.eq.s32.totalorder %s589_s19, 1 }
   0xe   : > { %p899_p9 = por %p151_p6, %p91_p1  ;;  %p635_p13 = scmp.lt.s32.totalorder %s821_s17, 2 }
   0xf   : > { %s904_s26 = scalar_select %p82_p7, %s809_s14, %s84_s21  }
  0x10   : > { %p906_p11 = por %p157_p10, %p97_p3  ;;  %s194_s28 = sand.u32 1, %s809_s14  }
  0x11   : > { %s594_s29 = sshll.u32 %s194_s28, 7  ;;  %s621_s30 = sshll.u32 %s817_s16, 11 }
  0x12   : > { %s209_s6 = scalar_lea.hbm %s1018_s1, %s621_s30  ;;  %s198_s7 = scalar_lea.vmem [#allocation3], %s594_s29 }
  0x13   : > { %s210_s8 = sshll.u32 %s198_s7, 4  ;;  %p919_p0 = pnand %p635_p13, %p889_p4  ;;  %s211_s8 = int_to_ptr.vmem [resolvable:$true] %s210_s8 }
  0x14   : > { %p597_p1 = scmp.ge.s32.totalorder %s821_s17, 1  ;;  %s195_s10 = scalar_lea.sflag [#allocation4], %s194_s28 }
  0x15   : > { %p715_p2 = pneg %p919_p0  ;;  %s726_s11 = scalar_lea.vmem %s211_s8, 2048 }
  0x16   : > { %p727_p3 = scmp.ne.s32.totalorder %s211_s8, %s726_s11  ;;  %s823_s18 = smov [#allocation3]  }
  0x17   : > { %s731_s19 = sshll.u32 %s823_s18, 4  ;;  %s732_s19 = int_to_ptr.vmem [resolvable:$false] %s731_s19 }
  0x18   : > { %p729_p5 = pnand %p727_p3, %p715_p2  ;;  %s733_s21 = scalar_lea.vmem %s732_s19, 4096 }
  0x19   : > { %p734_p7 = scmp.lt.s32.totalorder %s211_s8, %s732_s19  ;;  %p735_p10 = scmp.lt.s32.totalorder %s733_s21, %s726_s11 }
  0x1a   : > { %p730_p6 = pneg %p729_p5 }
  0x1b   : > { %p736_p12 = por %p735_p10, %p734_p7 }
  0x1d   : > { %p737_p4 = pnand %p736_p12, %p730_p6 }
  0x1f   : > { %740 = shalt.err (!%p737_p4)
}
  0x20   : > { %s824_s22 = smov 128   ;;  %s825_s23 = smov 8  }
  0x21   : > { %630 = dma.hbm_to_vmem [thread:$0]  (!%p919_p0), %s209_s6, 2048, %s211_s8, %s195_s10, %s824_s22, %s824_s22, %s825_s23  }
  0x22   : > { %p218_p13 = scmp.lt.s32.totalorder %s821_s17, 3 }
  0x24   : > { %p219_p2 = pnand %p597_p1, %p218_p13 }
  0x25   : > { %s932_s28 = sand.u32 (!%p219_p2), 1, %s805_s13  }
  0x26   : > { %222 = sbr.rel (%p219_p2) target bundleno = 289 (0x121), region = 32  ;;  %s598_s29 = sshll.u32 (!%p219_p2), %s932_s28, 7 }
  0x27   : > { %s225_s30 = scalar_lea.sflag (!%p219_p2), [#allocation4], %s932_s28  ;;  %s936_s4 = scalar_lea.vmem (!%p219_p2), [#allocation3], %s598_s29 }
  0x2b   : > { %792 = dma.done.wait (%p895_p8), %s225_s30, 2048  }
  0x2c   : > { %794 = vsyncadd (%p895_p8), %s225_s30, 4294965248  ;;  %v826_v0 = vmov 0   ;;  %v689_v1 = vld [vmem:[%s936_s4 + $0x74] ss:$8 sps:$4 sm:$0xff]   ;;  %v691_v2 = vld [vmem:[%s936_s4 + $0x70] ss:$8 sps:$4 sm:$0xff]  }
  0x2d   : > { %414 = vmatprep.mubr.bf16.mxu0 %v826_v0  ;;  %688 = vset.pattern.permute.xlu0 %v826_v0  ;;  %v692_v3 = vld [vmem:[%s936_s4 + $0x64] ss:$8 sps:$4 sm:$0xff]   ;;  %v694_v4 = vld [vmem:[%s936_s4 + $0x60] ss:$8 sps:$4 sm:$0xff]   ;;  %v695_v5 = vld [vmem:[%s936_s4 + $0x54] ss:$8 sps:$4 sm:$0xff]  }
  0x2e   : > { %382 = vmatprep.subr.bf16.mxu0 %v689_v1  ;;  %v697_v6 = vld [vmem:[%s936_s4 + $0x50] ss:$8 sps:$4 sm:$0xff]   ;;  %v698_v7 = vld [vmem:[%s936_s4 + $0x44] ss:$8 sps:$4 sm:$0xff]   ;;  %v700_v8 = vld [vmem:[%s936_s4 + $0x40] ss:$8 sps:$4 sm:$0xff]  }
  0x2f   : > { %383 = vmatpush1.bf16.msra.mxu0 %v691_v2  ;;  %v432_v9 = vld [vmem:[%s1019_s2] sm:$0xff]  ;;  %v701_v10 = vld [vmem:[%s936_s4 + $0x34] ss:$8 sps:$4 sm:$0xff]   ;;  %v703_v11 = vld [vmem:[%s936_s4 + $0x30] ss:$8 sps:$4 sm:$0xff]   ;;  %s599_s8 = sshll.u32 %s932_s28, 4 }
  0x30   : > { %384 = vmatprep.subr.bf16.mxu0 %v692_v3  ;;  %435 = vperm.xlu0 %688, %v432_v9   ;;  %v704_v12 = vld [vmem:[%s936_s4 + $0x24] ss:$8 sps:$4 sm:$0xff]   ;;  %v706_v13 = vld [vmem:[%s936_s4 + $0x20] ss:$8 sps:$4 sm:$0xff]   ;;  %v707_v14 = vld [vmem:[%s936_s4 + $0x14] ss:$8 sps:$4 sm:$0xff]  }
  0x31   : > { %v709_v15 = vld [vmem:[%s936_s4 + $0x10] ss:$8 sps:$4 sm:$0xff]   ;;  %v710_v16 = vld [vmem:[%s936_s4 + $0x4] ss:$8 sps:$4 sm:$0xff]   ;;  %v712_v17 = vld [vmem:[%s936_s4] ss:$8 sps:$4 sm:$0xff]  }
  0x32   : > { %v285_v18 = vld [vmem:[%s1017_s0] sm:$0xf]  ;;  %s622_s9 = sshll.u32 %s813_s15, 8  ;;  %s261_s10 = scalar_lea.vmem [#allocation6], %s599_s8 }
  0x33   : > { %385 = vmatpush1.bf16.msra.mxu0 %v694_v4  ;;  %s461_s11 = sshll.u32 %s261_s10, 4  ;;  %s969_s21 = scalar_lea.hbm %s1020_s3, %s622_s9  ;;  %s971_s11 = int_to_ptr.vmem [resolvable:$true] %s461_s11 }
  0x34   : > { %386 = vmatprep.subr.bf16.mxu0 %v695_v5  ;;  %s443_s15 = scalar_lea.sflag [#allocation5], %s932_s28  ;;  %s741_s22 = scalar_lea.vmem %s971_s11, 256 }
  0x35   : > { %p742_p8 = scmp.ne.s32.totalorder %s971_s11, %s741_s22  ;;  %s827_s23 = smov [#allocation6]  }
  0x36   : > { %s745_s29 = sshll.u32 %s827_s23, 4  ;;  %s746_s29 = int_to_ptr.vmem [resolvable:$false] %s745_s29 }
  0x37   : > { %387 = vmatpush1.bf16.msra.mxu0 %v697_v6  ;;  %p743_p12 = pnand %p742_p8, %p899_p9  ;;  %s747_s30 = scalar_lea.vmem %s746_s29, 512 }
  0x38   : > { %388 = vmatprep.subr.bf16.mxu0 %v698_v7  ;;  %p748_p1 = scmp.lt.s32.totalorder %s971_s11, %s746_s29  ;;  %p749_p3 = scmp.lt.s32.totalorder %s747_s30, %s741_s22 }
  0x39   : > { %p744_p0 = pneg %p743_p12 }
  0x3a   : > { %p750_p5 = por %p749_p3, %p748_p1 }
  0x3b   : > { %389 = vmatpush1.bf16.msra.mxu0 %v700_v8 }
  0x3c   : > { %390 = vmatprep.subr.bf16.mxu0 %v701_v10  ;;  %p751_p6 = pnand %p750_p5, %p744_p0 }
  0x3f   : > { %391 = vmatpush1.bf16.msra.mxu0 %v703_v11 }
  0x40   : > { %392 = vmatprep.subr.bf16.mxu0 %v704_v12 }
  0x43   : > { %393 = vmatpush1.bf16.msra.mxu0 %v706_v13 }
  0x44   : > { %394 = vmatprep.subr.bf16.mxu0 %v707_v14 }
  0x47   : > { %395 = vmatpush1.bf16.msra.mxu0 %v709_v15 }
  0x48   : > { %396 = vmatprep.subr.bf16.mxu0 %v710_v16 }
  0x4b   : > { %397 = vmatpush1.bf16.msra.mxu0 %v712_v17 }
  0x4e   : > { %415 = vmatmul.mubr.bf16.vlgmr.msra.gmra.mxu0 %v285_v18 }
  0xab   : > { %v436_v19 = vpop.permute.xlu0 %435 }
 0x10e   : > { %v416_v20 = vpop.f32.mrf.mxu0 }
 0x10f   : > { %v438_v21 = vadd.f32 %v436_v19, %v416_v20 }
 0x110   : > { %v418_v22 = vpop.f32.mrf.mxu0 }
 0x111   : > { %440 = vst [vmem:[%s261_s10] sm:$0xff] %v438_v21  ;;  %v439_v23 = vadd.f32 %v436_v19, %v418_v22 }
 0x112   : > { %v420_v24 = vpop.f32.mrf.mxu0 }
 0x113   : > { %441 = vst [vmem:[%s261_s10 + $0x8] sm:$0xff] %v439_v23 }
 0x114   : > { %v421_v25 = vpop.f32.mrf.mxu0 }
 0x115   : > { %754 = shalt.err (!%p751_p6)
}
 0x116   : > { %s755_s4 = scalar_lea.hbm %s969_s21, 256  ;;  %s759_s5 = scalar_lea.hbm %s1020_s3, 512 }
 0x117   : > { %p756_p7 = scmp.ne.s32.totalorder %s969_s21, %s755_s4  ;;  %p760_p13 = scmp.lt.s32.totalorder %s969_s21, %s1020_s3 }
 0x118   : > { %p761_p2 = scmp.lt.s32.totalorder %s759_s5, %s755_s4 }
 0x119   : > { %p757_p10 = pnand %p756_p7, %p899_p9 }
 0x11a   : > { %p762_p8 = por %p761_p2, %p760_p13 }
 0x11b   : > { %p758_p4 = pneg %p757_p10 }
 0x11d   : > { %p763_p12 = pnand %p762_p8, %p758_p4 }
 0x11f   : > { %766 = shalt.err (!%p763_p12)
}
 0x120   : > { %625 = dma.vmem_to_hbm [thread:$0]  (%p899_p9), %s971_s11, 256, %s969_s21, %s443_s15  }
 0x121 PF: > { %s473_s8 = sand.u32 1, %s801_s12   ;;  %p1026_p0 = scmp.ge.s32.totalorder %s821_s17, 2 }
 0x122   : > { %s474_s9 = scalar_lea.sflag [#allocation5], %s473_s8 }
 0x123   : > { %p632_p1 = pnand %p1026_p0, %p906_p11 }
 0x125   : > { %p633_p3 = pneg %p632_p1 }
 0x127   : > { %796 = dma.done.wait (%p633_p3), %s474_s9, 256  }
 0x128   : > { %798 = vsyncadd (%p633_p3), %s474_s9, 4294967040  ;;  %s19_s17 = sadd.s32 1, %s821_s17   ;;  %s1027_s12 = smov %s805_s13 }
 0x129   : > { %p16_p5 = scmp.ge.s32.totalorder %s19_s17, 4   ;;  %s1028_s13 = smov %s809_s14 }
 0x12a   : > { %s1029_s14 = smov %s904_s26  ;;  %s1030_s15 = smov %s817_s16 }
 0x12b   : > { %s1031_s16 = smov %s1033_s20  ;;  %18 = sbr.rel (!%p16_p5) target bundleno = 6 (0x6), region = 91 }
 0x130   :  { %479 = vsyncpa [#allocation4], 1 }
 0x131   :  { %481 = vsyncpa [#allocation4 + $0x1], 1 }
 0x132   :  { %482 = vsyncpa [#allocation5], 1 }
 0x133   :  { %484 = vsyncpa [#allocation5 + $0x1], 1 }

</bundles_post_ra>
